<compile_context>
chip_gen: v6e
topology: v6e:2x2x1
jax: 0.10.0
libtpu: 0.0.40
codegen_flags: <defaults>
</compile_context>

<pallas_src>
import math
import functools

import jax
import jax.numpy as jnp
from jax import lax
from jax.experimental import pallas as pl
from jax.experimental.pallas import tpu as pltpu


def _iou_linear_kernel(x_ref, w_ref, o_ref):
    # x_ref: (TM, D)   w_ref: (O, D) (PyTorch nn.Linear layout, lane-dense in D)
    # o_ref: (TM, O)
    x = x_ref[...].astype(jnp.float32)
    w = w_ref[...].astype(jnp.float32)
    if w_ref.shape[0] == 1:
        # O == 1: MXU would use 1/128-1/256 of its columns; do it on VPU + XLU.
        acc = jnp.sum(x * w, axis=-1, keepdims=True)
    else:
        # General O: contract last dims of both (x @ w.T) on the MXU, no transpose.
        acc = lax.dot_general(
            x, w, (((1,), (1,)), ((), ())), preferred_element_type=jnp.float32
        )
    o_ref[...] = acc.astype(o_ref.dtype)


def _round_up(v: int, m: int) -> int:
    return ((v + m - 1) // m) * m


def _choose_tile_m(M: int, D: int, itemsize: int,
                   budget_bytes: int = 16 * 1024 * 1024) -> int:
    """Largest row tile whose double-buffered x slab stays within `budget_bytes`,
    clamped to [8, 2048] and to a multiple of 8 (f32 sublane)."""
    tm = budget_bytes // max(1, 2 * D * itemsize)   # 2x for double buffering
    tm = max(8, min(tm, 2048))
    tm = (tm // 8) * 8
    tm = min(tm, _round_up(M, 8))
    return max(8, tm)


@functools.partial(jax.jit, static_argnames=("vmem_limit_bytes",))
def iou_probe_linear(x_flat: jax.Array, weight: jax.Array, bias: jax.Array,
                     *, vmem_limit_bytes: int = 32 * 1024 * 1024) -> jax.Array:
    """x_flat: (M, D); weight: (O, D) (PyTorch layout); bias: (O,). Returns (M, O)."""
    M, D = x_flat.shape
    O = weight.shape[0]
    itemsize = jnp.dtype(x_flat.dtype).itemsize

    TM = _choose_tile_m(M, D, itemsize)
    grid = (pl.cdiv(M, TM),)

    cost = pl.CostEstimate(
        flops=2 * M * D * O,
        transcendentals=0,
        bytes_accessed=(M * D + O * D + M * O) * itemsize,
    )

    y = pl.pallas_call(
        _iou_linear_kernel,
        out_shape=jax.ShapeDtypeStruct((M, O), x_flat.dtype),
        grid_spec=pltpu.PrefetchScalarGridSpec(
            num_scalar_prefetch=0,
            grid=grid,
            in_specs=[
                pl.BlockSpec((TM, D), lambda i: (i, 0)),   # row tiles, pipelined
                pl.BlockSpec((O, D), lambda i: (0, 0)),    # full weight, resident
            ],
            out_specs=pl.BlockSpec((TM, O), lambda i: (i, 0)),
        ),
        compiler_params=pltpu.CompilerParams(
            dimension_semantics=("parallel",),             # shard row tiles across TCs (v7x)
            vmem_limit_bytes=vmem_limit_bytes,
        ),
        cost_estimate=cost,
    )(x_flat, weight)

    # Bias add in the wrapper: avoids a padded (1, O) VMEM tile in the kernel.
    return y + bias[None, :]


def iou_probe_forward(batched_features, weight, bias):
    """Mirrors IoUProbe.forward.

    batched_features: dict with key 'pos_img' -> (B, N, in_dim)
    weight: (out_dim, in_dim)  (PyTorch nn.Linear layout)
    bias:   (out_dim,)
    Returns {'pred_iou': [ (N, out_dim) per batch element ]}
    """
    x = batched_features["pos_img"]                      # (B, N, D)
    B, N, D = x.shape
    O = weight.shape[0]
    x_flat = x.reshape(B * N, D)                         # row-major flatten
    y_flat = iou_probe_linear(x_flat, weight, bias)      # (B*N, O)
    pred_iou = y_flat.reshape(B, N, O)
    # Per-sample list to preserve the module's output semantics; prefer the
    # stacked (B, N, O) array directly for large B to avoid B extra dispatches.
    return {"pred_iou": [pred_iou[i] for i in range(B)]}


if __name__ == "__main__":
    # Small shapes: batch=2, seq(boxes)=8, hidden(in_dim)=32, out_dim=1
    B, N, in_dim, out_dim = 2, 8, 32, 1

    key = jax.random.PRNGKey(0)
    kx, kw, kb = jax.random.split(key, 3)

    # Deterministic init matching nn.Linear's uniform(-1/sqrt(fan_in), ...)
    bound = 1.0 / math.sqrt(in_dim)
    weight = jax.random.uniform(kw, (out_dim, in_dim), jnp.float32, -bound, bound)
    bias = jax.random.uniform(kb, (out_dim,), jnp.float32, -bound, bound)

    x = jax.random.normal(kx, (B, N, in_dim), jnp.float32)
    batched_features = {"pos_img": x}

    out = iou_probe_forward(batched_features, weight, bias)
    pred_list = out["pred_iou"]
    jax.block_until_ready(pred_list)

    # Reference check in plain JAX
    ref = jnp.einsum("bnd,od->bno", x, weight) + bias
    got = jnp.stack(pred_list, axis=0)
    assert got.shape == (B, N, out_dim), got.shape
    assert jnp.allclose(got, ref, atol=1e-5, rtol=1e-5), "mismatch vs reference"

    print("KERNEL_OK")
</pallas_src>

<mosaic_0001>
module attributes {stable_mosaic.version = 11 : i64} {
  func.func @_iou_linear_kernel(%arg0: i32, %arg1: memref<16x32xf32, #tpu.memory_space<vmem>>, %arg2: memref<1x32xf32, #tpu.memory_space<vmem>>, %arg3: memref<16x1xf32, #tpu.memory_space<vmem>>) attributes {dimension_semantics = [#tpu.dimension_semantics<parallel>], iteration_bounds = array<i64: 1>, scalar_prefetch = 0 : i64, scratch_operands = 0 : i64, tpu.core_type = #tpu.core_type<tc>, window_params = [{transform_indices = @transform_0, window_bounds = array<i64: 16, 32>}, {pipeline_mode = #tpu.pipeline_mode<synchronous>, transform_indices = @transform_1, window_bounds = array<i64: 1, 32>}, {transform_indices = @transform_2, window_bounds = array<i64: 16, 1>}]} {
    %c0 = arith.constant 0 : index
    %c0_0 = arith.constant 0 : index
    %0 = vector.load %arg1[%c0, %c0_0] : memref<16x32xf32, #tpu.memory_space<vmem>>, vector<16x32xf32>
    %c0_1 = arith.constant 0 : index
    %c0_2 = arith.constant 0 : index
    %1 = vector.load %arg2[%c0_1, %c0_2] : memref<1x32xf32, #tpu.memory_space<vmem>>, vector<1x32xf32>
    %2 = vector.broadcast %1 : vector<1x32xf32> to vector<16x32xf32>
    %3 = arith.mulf %0, %2 : vector<16x32xf32>
    %cst = arith.constant dense<0.000000e+00> : vector<16xf32>
    %4 = vector.multi_reduction <add>, %3, %cst [1] : vector<16x32xf32> to vector<16xf32>
    %5 = vector.shape_cast %4 : vector<16xf32> to vector<16x1xf32>
    %c0_3 = arith.constant 0 : index
    %c0_4 = arith.constant 0 : index
    %6 = vector.load %arg3[%c0_3, %c0_4] : memref<16x1xf32, #tpu.memory_space<vmem>>, vector<16x1xf32>
    tpu.vector_store %arg3[%c0_3, %c0_4], %5 {strides = array<i32>} : memref<16x1xf32, #tpu.memory_space<vmem>>, vector<16x1xf32>,
    return
  }
  func.func @transform_0(%arg0: i32) -> (i32, i32) {
    %c0_i32 = arith.constant 0 : i32
    %c0_i32_0 = arith.constant 0 : i32
    return %arg0, %c0_i32 : i32, i32
  }
  func.func @transform_1(%arg0: i32) -> (i32, i32) {
    %c0_i32 = arith.constant 0 : i32
    %c0_i32_0 = arith.constant 0 : i32
    %c0_i32_1 = arith.constant 0 : i32
    return %c0_i32, %c0_i32_0 : i32, i32
  }
  func.func @transform_2(%arg0: i32) -> (i32, i32) {
    %c0_i32 = arith.constant 0 : i32
    %c0_i32_0 = arith.constant 0 : i32
    return %arg0, %c0_i32 : i32, i32
  }
}

</mosaic_0001>

<bundles_post_ra>
// kernel: iou_probe_linear.1
= control target key start
LH: loop header
LB: loop body
LE: loop exit
PB: predicated region body
PF: predicated region fallthrough
CT: control target
= control target key end

     0   :  { %7 = vsyncpa [#allocation3], 0  ;;  %s77_s9 = smov [#allocation2]   ;;  %s107_s0 = inlined_call_operand.hbm [shape: f32[16,32], index: 0, kind: input, shape index: {}]   ;;  %s108_s1 = inlined_call_operand.vmem [shape: f32[1,32], index: 1, kind: input, shape index: {}]   ;;  %s109_s2 = inlined_call_operand.vmem [shape: f32[16,1], index: 2, kind: output, shape index: {}]  }
   0x1   :  { %s13_s10 = sshll.u32 %s77_s9, 4  ;;  %s14_s10 = int_to_ptr.vmem [resolvable:$true] %s13_s10 }
   0x2   :  { %s63_s11 = scalar_lea.vmem %s14_s10, 256  ;;  %p68_p1 = scmp.lt.s32.totalorder %s14_s10, %s14_s10 }
   0x3   :  { %p64_p0 = scmp.ne.s32.totalorder %s14_s10, %s63_s11  ;;  %p69_p2 = scmp.lt.s32.totalorder %s63_s11, %s63_s11 }
   0x5   :  { %p70_p3 = por %p69_p2, %p68_p1 }
   0x7   :  { %p71_p4 = pnand %p70_p3, %p64_p0 }
   0x9   :  { %74 = shalt.err (!%p71_p4)
}
   0xa   :  { %s78_s12 = smov 128   ;;  %s79_s13 = smov 8  }
   0xb   :  { %19 = dma.hbm_to_vmem [thread:$0]  %s107_s0, 256, %s14_s10, [#allocation3], %s78_s12, %s78_s12, %s79_s13  }
   0xc   :  { %75 = dma.done.wait [#allocation3], 256  }
   0xd   :  { %76 = vsyncadd [#allocation3], 4294967040  ;;  %v25_v0 = vld [vmem:[#allocation2] sm:$0xff]  ;;  %vm36_vm0 = vcmask 261120   ;;  %v26_v2 = vld [vmem:[#allocation2 + $0x8] sm:$0xff]  ;;  %vm43_vm1 = vcmask 7168  }
   0xe   :  { %v51_v1 = vld [vmem:[%s108_s1] ss:$0 sm:$0xff] }
   0xf   :  { %v34_v3 = vmul.f32 %v51_v1, %v25_v0  ;;  %v35_v4 = vmul.f32 %v51_v1, %v26_v2 }
  0x11   :  { %v37_v5 = vsel %vm36_vm0, %v34_v3, 0.0  ;;  %v40_v6 = vsel %vm36_vm0, %v35_v4, 0.0 }
  0x12   :  { %38 = vadd.xlane.f32.xlu0 %v37_v5 }
  0x16   :  { %41 = vadd.xlane.f32.xlu0 %v40_v6 }
  0x9b   :  { %v39_v7 = vpop.xlane.xlu0 %38 }
  0x9c   :  { %44 = vst.msk [vmem:[%s109_s2] sm:$0xff] %vm43_vm1, %v39_v7 }
  0x9f   :  { %v42_v8 = vpop.xlane.xlu0 %41 }
  0xa0   :  { %45 = vst.msk [vmem:[%s109_s2 + $0x8] sm:$0xff] %vm43_vm1, %v42_v8 }
  0xa1   :  { %50 = vsyncpa [#allocation3], 1 }

</bundles_post_ra>
